<compile_context>
chip_gen: v7x
topology: tpu7x:2x2x1
jax: 0.10.0
libtpu: 0.0.40
codegen_flags: <defaults>
</compile_context>

<pallas_src>
import functools

import jax
import jax.numpy as jnp
from jax.experimental import pallas as pl
from jax.experimental.pallas import tpu as pltpu

EPS = 1e-6   # RMSNorm eps (affine=False => no learned scale)
LANE = 128


# --------------------------------------------------------------------------
# shared per-block math (f32 residual, bf16 MXU inputs, f32 accumulate)
# --------------------------------------------------------------------------
def _mlp_block(x, w1, w2, inv_dim):
    w_dtype = w1.dtype
    # RMSNorm over the *real* dim: padded lanes are exactly zero, so a
    # full-lane sum times 1/dim_real equals the unpadded mean.
    ms = jnp.sum(x * x, axis=-1, keepdims=True) * inv_dim
    h = x * jax.lax.rsqrt(ms + EPS)
    a = jnp.dot(h.astype(w_dtype), w1, preferred_element_type=jnp.float32)
    r = jnp.maximum(a, 0.0)
    r = r * r
    y = jnp.dot(r.astype(w_dtype), w2, preferred_element_type=jnp.float32)
    return x + y


# --------------------------------------------------------------------------
# kernels
# --------------------------------------------------------------------------
def _resident_kernel(inv_dim, depth, unroll, x_ref, w1_ref, w2_ref, o_ref):
    """Whole weight stacks VMEM-resident; depth fused as a bounded-unroll loop."""
    x0 = x_ref[...].astype(jnp.float32)
    body = lambda d, x: _mlp_block(x, w1_ref[d], w2_ref[d], inv_dim)
    x_out = jax.lax.fori_loop(0, depth, body, x0, unroll=unroll)
    o_ref[...] = x_out.astype(o_ref.dtype)


def _streaming_kernel(inv_dim, x_ref, w1_ref, w2_ref, o_ref, acc_ref):
    """Depth is a trailing 'arbitrary' grid axis; residual carried in scratch."""
    d = pl.program_id(1)

    @pl.when(d == 0)
    def _():
        acc_ref[...] = x_ref[...].astype(jnp.float32)

    acc_ref[...] = _mlp_block(acc_ref[...], w1_ref[0], w2_ref[0], inv_dim)

    @pl.when(d == pl.num_programs(1) - 1)
    def _():
        o_ref[...] = acc_ref[...].astype(o_ref.dtype)


# --------------------------------------------------------------------------
# wrapper
# --------------------------------------------------------------------------
def _pad_to(n, m):
    return ((n + m - 1) // m) * m


def _vmem_limit_bytes():
    try:
        cap = pltpu.get_tpu_info().vmem_capacity_bytes
    except Exception:
        cap = 64 * 1024 * 1024  # conservative fallback (v7x physical VMEM)
    # ~96 MiB on v5e/v6e (128 MiB physical), ~48 MiB on v7x (64 MiB physical).
    return min((cap * 3) // 4, 100 * 1024 * 1024)


def _token_tile(n, d_pad, m_pad, vmem_limit):
    """Largest sublane-aligned divisor of n whose f32 working set fits the VMEM
    budget, then halved (down to 8) so the parallel axis has >= 2 grid steps."""
    tn = None
    for cand in (1024, 512, 256, 128, 64, 32, 16, 8):
        if cand <= n and n % cand == 0:
            # x / norm / residual (d_pad) + hidden / relu^2 (m_pad), f32.
            work = cand * (3 * d_pad + 2 * m_pad) * 4
            if work <= vmem_limit // 4:
                tn = cand
                break
    if tn is None:
        tn = n  # tiny / irregular n: single tile covering the full extent
    while tn >= 16 and tn % 16 == 0 and n // tn < 2:
        tn //= 2  # give megacore (v7x) at least 2 parallel steps
    return tn


@functools.partial(jax.jit, static_argnames=("force_streaming",))
def mlp_stack(x, w1, w2, force_streaming=False):
    """x: [..., dim], w1: [depth, dim, mlp_dim], w2: [depth, mlp_dim, dim]."""
    orig_shape = x.shape
    dim = orig_shape[-1]
    depth, _, mlp_dim = w1.shape
    assert w1.shape == (depth, dim, mlp_dim) and w2.shape == (depth, mlp_dim, dim)

    x2 = x.reshape(-1, dim)
    n = x2.shape[0]

    # Explicit precision policy: bf16 MXU inputs (halves weight HBM/VMEM
    # traffic, native MXU rate); f32 accumulate + residual inside the kernel.
    w1 = w1.astype(jnp.bfloat16)
    w2 = w2.astype(jnp.bfloat16)

    # Lane-dense layout: pad dim / mlp_dim to multiples of 128 with zeros.
    d_pad = _pad_to(dim, LANE)
    m_pad = _pad_to(mlp_dim, LANE)
    xp = jnp.pad(x2, ((0, 0), (0, d_pad - dim)))
    w1p = jnp.pad(w1, ((0, 0), (0, d_pad - dim), (0, m_pad - mlp_dim)))
    w2p = jnp.pad(w2, ((0, 0), (0, m_pad - mlp_dim), (0, d_pad - dim)))

    vmem_limit = _vmem_limit_bytes()
    tn = _token_tile(n, d_pad, m_pad, vmem_limit)
    assert n % tn == 0, "token tile must divide N (no tokens may be dropped)"
    grid_n = n // tn
    inv_dim = 1.0 / dim

    w_bytes = depth * 2 * d_pad * m_pad * w1p.dtype.itemsize
    resident = (not force_streaming) and (w_bytes <= vmem_limit // 2)

    if resident:
        kernel = functools.partial(_resident_kernel, inv_dim, depth,
                                   min(depth, 4))
        grid_spec = pltpu.PrefetchScalarGridSpec(
            num_scalar_prefetch=0,
            grid=(grid_n,),
            in_specs=[
                pl.BlockSpec((tn, d_pad), lambda i: (i, 0)),
                # Constant block index across the grid -> single-buffer the
                # weight stacks (half the weight VMEM footprint).
                pl.BlockSpec((depth, d_pad, m_pad), lambda i: (0, 0, 0),
                             pipeline_mode=pl.Buffered(1)),
                pl.BlockSpec((depth, m_pad, d_pad), lambda i: (0, 0, 0),
                             pipeline_mode=pl.Buffered(1)),
            ],
            out_specs=pl.BlockSpec((tn, d_pad), lambda i: (i, 0)),
        )
        dim_sem = ("parallel",)
    else:
        kernel = functools.partial(_streaming_kernel, inv_dim)
        grid_spec = pltpu.PrefetchScalarGridSpec(
            num_scalar_prefetch=0,
            grid=(grid_n, depth),
            in_specs=[
                pl.BlockSpec((tn, d_pad), lambda i, d: (i, 0)),
                pl.BlockSpec((1, d_pad, m_pad), lambda i, d: (d, 0, 0)),
                pl.BlockSpec((1, m_pad, d_pad), lambda i, d: (d, 0, 0)),
            ],
            out_specs=pl.BlockSpec((tn, d_pad), lambda i, d: (i, 0)),
            scratch_shapes=[pltpu.VMEM((tn, d_pad), jnp.float32)],
        )
        dim_sem = ("parallel", "arbitrary")

    out_p = pl.pallas_call(
        kernel,
        out_shape=jax.ShapeDtypeStruct((n, d_pad), x.dtype),
        grid_spec=grid_spec,
        compiler_params=pltpu.CompilerParams(
            dimension_semantics=dim_sem,
            vmem_limit_bytes=vmem_limit,
        ),
    )(xp, w1p, w2p)

    return out_p[:, :dim].reshape(orig_shape)


# --------------------------------------------------------------------------
# pure-JAX reference (same precision policy as the kernel)
# --------------------------------------------------------------------------
def ref_mlp_stack(x, w1, w2):
    w1 = w1.astype(jnp.bfloat16)
    w2 = w2.astype(jnp.bfloat16)
    xf = x.astype(jnp.float32)
    for d in range(w1.shape[0]):
        ms = jnp.mean(xf * xf, axis=-1, keepdims=True)
        h = xf * jax.lax.rsqrt(ms + EPS)
        a = jnp.dot(h.astype(jnp.bfloat16).astype(jnp.float32),
                    w1[d].astype(jnp.float32))
        r = jnp.maximum(a, 0.0) ** 2
        y = jnp.dot(r.astype(jnp.bfloat16).astype(jnp.float32),
                    w2[d].astype(jnp.float32))
        xf = xf + y
    return xf.astype(x.dtype)


if __name__ == "__main__":
    # Shapes consistent with the module: batch=2, seq=8, dim=32, mlp_dim=64,
    # depth=3 (the kernel flattens tokens to N = batch*seq = 16).
    B, T, DIM, MLP_DIM, DEPTH = 2, 8, 32, 64, 3

    key = jax.random.PRNGKey(0)
    kx, k1, k2 = jax.random.split(key, 3)

    x = jax.random.normal(kx, (B, T, DIM), dtype=jnp.float32)
    # FusedLinear(dim, mlp_dim): applied as x @ W, no bias; stored bf16.
    w1 = (jax.random.normal(k1, (DEPTH, DIM, MLP_DIM), dtype=jnp.float32)
          / jnp.sqrt(DIM)).astype(jnp.bfloat16)
    # NOTE: the module zero-inits the second linear (forward == identity at
    # init).  Small random weights exercise the hot path; use zeros to match
    # zero_init exactly.
    w2 = (0.02 * jax.random.normal(k2, (DEPTH, MLP_DIM, DIM),
                                   dtype=jnp.float32)).astype(jnp.bfloat16)

    ref = ref_mlp_stack(x, w1, w2)

    # Resident path (whole bf16 weight stacks VMEM-resident, single-buffered).
    out = jax.block_until_ready(mlp_stack(x, w1, w2))
    assert out.shape == (B, T, DIM) and out.dtype == x.dtype
    err = jnp.max(jnp.abs(out - ref))
    assert jnp.allclose(out, ref, atol=1e-3, rtol=1e-3), f"resident max err {err}"

    # Streaming path (depth grid axis, per-layer weight DMA): the design used
    # when the weight stacks do not fit VMEM (v7x); exercised here for coverage.
    out_s = jax.block_until_ready(mlp_stack(x, w1, w2, force_streaming=True))
    err_s = jnp.max(jnp.abs(out_s - ref))
    assert jnp.allclose(out_s, ref, atol=1e-3, rtol=1e-3), f"streaming max err {err_s}"

    print("KERNEL_OK")
</pallas_src>

<mosaic_0001>
module attributes {stable_mosaic.version = 11 : i64} {
  func.func @_resident_kernel(%arg0: i32, %arg1: memref<8x128xf32, #tpu.memory_space<vmem>>, %arg2: memref<3x128x128xbf16, #tpu.memory_space<vmem>>, %arg3: memref<3x128x128xbf16, #tpu.memory_space<vmem>>, %arg4: memref<8x128xf32, #tpu.memory_space<vmem>>) attributes {dimension_semantics = [#tpu.dimension_semantics<parallel>], iteration_bounds = array<i64: 2>, scalar_prefetch = 0 : i64, scratch_operands = 0 : i64, tpu.core_type = #tpu.core_type<tc>, window_params = [{transform_indices = @transform_0, window_bounds = array<i64: 8, 128>}, {pipeline_mode = #tpu.pipeline_mode<synchronous>, transform_indices = @transform_1, window_bounds = array<i64: 3, 128, 128>}, {pipeline_mode = #tpu.pipeline_mode<synchronous>, transform_indices = @transform_2, window_bounds = array<i64: 3, 128, 128>}, {transform_indices = @transform_3, window_bounds = array<i64: 8, 128>}]} {
    %c0 = arith.constant 0 : index
    %c0_0 = arith.constant 0 : index
    %0 = vector.load %arg1[%c0, %c0_0] : memref<8x128xf32, #tpu.memory_space<vmem>>, vector<8x128xf32>
    %c0_i32 = arith.constant 0 : i32
    %1 = arith.index_cast %c0_i32 : i32 to index
    %c0_1 = arith.constant 0 : index
    %c0_2 = arith.constant 0 : index
    %2 = vector.load %arg2[%1, %c0_1, %c0_2] : memref<3x128x128xbf16, #tpu.memory_space<vmem>>, vector<1x128x128xbf16>
    %3 = vector.shape_cast %2 : vector<1x128x128xbf16> to vector<128x128xbf16>
    %4 = arith.index_cast %c0_i32 : i32 to index
    %c0_3 = arith.constant 0 : index
    %c0_4 = arith.constant 0 : index
    %5 = vector.load %arg3[%4, %c0_3, %c0_4] : memref<3x128x128xbf16, #tpu.memory_space<vmem>>, vector<1x128x128xbf16>
    %6 = vector.shape_cast %5 : vector<1x128x128xbf16> to vector<128x128xbf16>
    %7 = arith.mulf %0, %0 : vector<8x128xf32>
    %cst = arith.constant dense<0.000000e+00> : vector<8xf32>
    %8 = vector.multi_reduction <add>, %7, %cst [1] : vector<8x128xf32> to vector<8xf32>
    %9 = vector.shape_cast %8 : vector<8xf32> to vector<8x1xf32>
    %cst_5 = arith.constant 3.125000e-02 : f32
    %10 = vector.broadcast %cst_5 : f32 to vector<8x1xf32>
    %11 = arith.mulf %9, %10 : vector<8x1xf32>
    %cst_6 = arith.constant 9.99999997E-7 : f32
    %12 = vector.broadcast %cst_6 : f32 to vector<8x1xf32>
    %13 = arith.addf %11, %12 : vector<8x1xf32>
    %14 = math.rsqrt %13 : vector<8x1xf32>
    %15 = vector.broadcast %14 : vector<8x1xf32> to vector<8x128xf32>
    %16 = arith.mulf %0, %15 : vector<8x128xf32>
    %17 = arith.truncf %16 : vector<8x128xf32> to vector<8x128xbf16>
    %cst_7 = arith.constant dense<0.000000e+00> : vector<8x128xf32>
    %18 = tpu.matmul %17, %3, %cst_7 {dimension_numbers = #tpu.dot_dimension_numbers<[1], [0], [0], [1], [0, 0, 1, 1], [], []>} : vector<8x128xbf16>, vector<128x128xbf16>, vector<8x128xf32> -> vector<8x128xf32>
    %cst_8 = arith.constant 0.000000e+00 : f32
    %19 = vector.broadcast %cst_8 : f32 to vector<8x128xf32>
    %20 = arith.maximumf %18, %19 : vector<8x128xf32>
    %21 = arith.mulf %20, %20 : vector<8x128xf32>
    %22 = arith.truncf %21 : vector<8x128xf32> to vector<8x128xbf16>
    %cst_9 = arith.constant dense<0.000000e+00> : vector<8x128xf32>
    %23 = tpu.matmul %22, %6, %cst_9 {dimension_numbers = #tpu.dot_dimension_numbers<[1], [0], [0], [1], [0, 0, 1, 1], [], []>} : vector<8x128xbf16>, vector<128x128xbf16>, vector<8x128xf32> -> vector<8x128xf32>
    %24 = arith.addf %0, %23 : vector<8x128xf32>
    %c1_i32 = arith.constant 1 : i32
    %25 = arith.index_cast %c1_i32 : i32 to index
    %c0_10 = arith.constant 0 : index
    %c0_11 = arith.constant 0 : index
    %26 = vector.load %arg2[%25, %c0_10, %c0_11] : memref<3x128x128xbf16, #tpu.memory_space<vmem>>, vector<1x128x128xbf16>
    %27 = vector.shape_cast %26 : vector<1x128x128xbf16> to vector<128x128xbf16>
    %28 = arith.index_cast %c1_i32 : i32 to index
    %c0_12 = arith.constant 0 : index
    %c0_13 = arith.constant 0 : index
    %29 = vector.load %arg3[%28, %c0_12, %c0_13] : memref<3x128x128xbf16, #tpu.memory_space<vmem>>, vector<1x128x128xbf16>
    %30 = vector.shape_cast %29 : vector<1x128x128xbf16> to vector<128x128xbf16>
    %31 = arith.mulf %24, %24 : vector<8x128xf32>
    %cst_14 = arith.constant dense<0.000000e+00> : vector<8xf32>
    %32 = vector.multi_reduction <add>, %31, %cst_14 [1] : vector<8x128xf32> to vector<8xf32>
    %33 = vector.shape_cast %32 : vector<8xf32> to vector<8x1xf32>
    %cst_15 = arith.constant 3.125000e-02 : f32
    %34 = vector.broadcast %cst_15 : f32 to vector<8x1xf32>
    %35 = arith.mulf %33, %34 : vector<8x1xf32>
    %cst_16 = arith.constant 9.99999997E-7 : f32
    %36 = vector.broadcast %cst_16 : f32 to vector<8x1xf32>
    %37 = arith.addf %35, %36 : vector<8x1xf32>
    %38 = math.rsqrt %37 : vector<8x1xf32>
    %39 = vector.broadcast %38 : vector<8x1xf32> to vector<8x128xf32>
    %40 = arith.mulf %24, %39 : vector<8x128xf32>
    %41 = arith.truncf %40 : vector<8x128xf32> to vector<8x128xbf16>
    %cst_17 = arith.constant dense<0.000000e+00> : vector<8x128xf32>
    %42 = tpu.matmul %41, %27, %cst_17 {dimension_numbers = #tpu.dot_dimension_numbers<[1], [0], [0], [1], [0, 0, 1, 1], [], []>} : vector<8x128xbf16>, vector<128x128xbf16>, vector<8x128xf32> -> vector<8x128xf32>
    %cst_18 = arith.constant 0.000000e+00 : f32
    %43 = vector.broadcast %cst_18 : f32 to vector<8x128xf32>
    %44 = arith.maximumf %42, %43 : vector<8x128xf32>
    %45 = arith.mulf %44, %44 : vector<8x128xf32>
    %46 = arith.truncf %45 : vector<8x128xf32> to vector<8x128xbf16>
    %cst_19 = arith.constant dense<0.000000e+00> : vector<8x128xf32>
    %47 = tpu.matmul %46, %30, %cst_19 {dimension_numbers = #tpu.dot_dimension_numbers<[1], [0], [0], [1], [0, 0, 1, 1], [], []>} : vector<8x128xbf16>, vector<128x128xbf16>, vector<8x128xf32> -> vector<8x128xf32>
    %48 = arith.addf %24, %47 : vector<8x128xf32>
    %c2_i32 = arith.constant 2 : i32
    %49 = arith.index_cast %c2_i32 : i32 to index
    %c0_20 = arith.constant 0 : index
    %c0_21 = arith.constant 0 : index
    %50 = vector.load %arg2[%49, %c0_20, %c0_21] : memref<3x128x128xbf16, #tpu.memory_space<vmem>>, vector<1x128x128xbf16>
    %51 = vector.shape_cast %50 : vector<1x128x128xbf16> to vector<128x128xbf16>
    %52 = arith.index_cast %c2_i32 : i32 to index
    %c0_22 = arith.constant 0 : index
    %c0_23 = arith.constant 0 : index
    %53 = vector.load %arg3[%52, %c0_22, %c0_23] : memref<3x128x128xbf16, #tpu.memory_space<vmem>>, vector<1x128x128xbf16>
    %54 = vector.shape_cast %53 : vector<1x128x128xbf16> to vector<128x128xbf16>
    %55 = arith.mulf %48, %48 : vector<8x128xf32>
    %cst_24 = arith.constant dense<0.000000e+00> : vector<8xf32>
    %56 = vector.multi_reduction <add>, %55, %cst_24 [1] : vector<8x128xf32> to vector<8xf32>
    %57 = vector.shape_cast %56 : vector<8xf32> to vector<8x1xf32>
    %cst_25 = arith.constant 3.125000e-02 : f32
    %58 = vector.broadcast %cst_25 : f32 to vector<8x1xf32>
    %59 = arith.mulf %57, %58 : vector<8x1xf32>
    %cst_26 = arith.constant 9.99999997E-7 : f32
    %60 = vector.broadcast %cst_26 : f32 to vector<8x1xf32>
    %61 = arith.addf %59, %60 : vector<8x1xf32>
    %62 = math.rsqrt %61 : vector<8x1xf32>
    %63 = vector.broadcast %62 : vector<8x1xf32> to vector<8x128xf32>
    %64 = arith.mulf %48, %63 : vector<8x128xf32>
    %65 = arith.truncf %64 : vector<8x128xf32> to vector<8x128xbf16>
    %cst_27 = arith.constant dense<0.000000e+00> : vector<8x128xf32>
    %66 = tpu.matmul %65, %51, %cst_27 {dimension_numbers = #tpu.dot_dimension_numbers<[1], [0], [0], [1], [0, 0, 1, 1], [], []>} : vector<8x128xbf16>, vector<128x128xbf16>, vector<8x128xf32> -> vector<8x128xf32>
    %cst_28 = arith.constant 0.000000e+00 : f32
    %67 = vector.broadcast %cst_28 : f32 to vector<8x128xf32>
    %68 = arith.maximumf %66, %67 : vector<8x128xf32>
    %69 = arith.mulf %68, %68 : vector<8x128xf32>
    %70 = arith.truncf %69 : vector<8x128xf32> to vector<8x128xbf16>
    %cst_29 = arith.constant dense<0.000000e+00> : vector<8x128xf32>
    %71 = tpu.matmul %70, %54, %cst_29 {dimension_numbers = #tpu.dot_dimension_numbers<[1], [0], [0], [1], [0, 0, 1, 1], [], []>} : vector<8x128xbf16>, vector<128x128xbf16>, vector<8x128xf32> -> vector<8x128xf32>
    %72 = arith.addf %48, %71 : vector<8x128xf32>
    %c3_i32 = arith.constant 3 : i32
    %c0_30 = arith.constant 0 : index
    %c0_31 = arith.constant 0 : index
    %73 = vector.load %arg4[%c0_30, %c0_31] : memref<8x128xf32, #tpu.memory_space<vmem>>, vector<8x128xf32>
    tpu.vector_store %arg4[%c0_30, %c0_31], %72 {strides = array<i32>} : memref<8x128xf32, #tpu.memory_space<vmem>>, vector<8x128xf32>,
    return
  }
  func.func @transform_0(%arg0: i32) -> (i32, i32) {
    %c0_i32 = arith.constant 0 : i32
    %c0_i32_0 = arith.constant 0 : i32
    return %arg0, %c0_i32 : i32, i32
  }
  func.func @transform_1(%arg0: i32) -> (i32, i32, i32) {
    %c0_i32 = arith.constant 0 : i32
    %c0_i32_0 = arith.constant 0 : i32
    %c0_i32_1 = arith.constant 0 : i32
    %c0_i32_2 = arith.constant 0 : i32
    return %c0_i32, %c0_i32_0, %c0_i32_1 : i32, i32, i32
  }
  func.func @transform_2(%arg0: i32) -> (i32, i32, i32) {
    %c0_i32 = arith.constant 0 : i32
    %c0_i32_0 = arith.constant 0 : i32
    %c0_i32_1 = arith.constant 0 : i32
    %c0_i32_2 = arith.constant 0 : i32
    return %c0_i32, %c0_i32_0, %c0_i32_1 : i32, i32, i32
  }
  func.func @transform_3(%arg0: i32) -> (i32, i32) {
    %c0_i32 = arith.constant 0 : i32
    %c0_i32_0 = arith.constant 0 : i32
    return %arg0, %c0_i32 : i32, i32
  }
}

</mosaic_0001>

<bundles_post_ra>
// kernel: mlp_stack.1
= control target key start
LH: loop header
LB: loop body
LE: loop exit
PB: predicated region body
PF: predicated region fallthrough
CT: control target
= control target key end

     0   :  { %s1275_s12 = smov 0   ;;  %s1515_s0 = inlined_call_operand.vmem [shape: f32[16,128], index: 0, kind: input, shape index: {}]   ;;  %s1516_s1 = inlined_call_operand.vmem [shape: bf16[3,128,128], index: 1, kind: input, shape index: {}]   ;;  %s1517_s2 = inlined_call_operand.vmem [shape: bf16[3,128,128], index: 2, kind: input, shape index: {}]   ;;  %s1518_s3 = inlined_call_operand.vmem [shape: f32[16,128], index: 3, kind: output, shape index: {}]  }
   0x1 LB: > { %s886_s13 = sadd.s32 4294967295, %s1251_s12   ;;  %p890_p0 = scmp.ge.s32.totalorder %s1251_s12, 1  ;;  %s1251_s12 = sphi %s1275_s12, %s13_s12  }
   0x2   : > { %p136_p1 = scmp.lt.s32.totalorder %s1251_s12, 3 }
   0x4   : > { %p137_p2 = pnand %p890_p0, %p136_p1 }
   0x5   : > { %p158_p3 = scmp.lt.s32.totalorder (!%p137_p2), %s886_s13, 1  ;;  %v1253_v0 = vmov (!%p137_p2), 0.0   ;;  %v1191_v1 = vld [vmem:[%s1516_s1] sm:$0xff] (!%p137_p2)   ;;  %v1192_v2 = vld [vmem:[%s1516_s1 + $0x8] sm:$0xff] (!%p137_p2)   ;;  %v1193_v3 = vld [vmem:[%s1516_s1 + $0x10] sm:$0xff] (!%p137_p2)   ;;  %vm1254_vm0 = vmmov (!%p137_p2), 0  }
   0x6   : > { %140 = sbr.rel (%p137_p2) target bundleno = 1803 (0x70b), region = 32  ;;  %1061 = vmatprep.subr.bf16.mxu0 (!%p137_p2), %v1253_v0  ;;  %1081 = vmatprep.subr.bf16.mxu1 (!%p137_p2), %v1253_v0  ;;  %v1194_v6 = vld [vmem:[%s1516_s1 + $0x18] sm:$0xff] (!%p137_p2)   ;;  %v1195_v7 = vld [vmem:[%s1516_s1 + $0x20] sm:$0xff] (!%p137_p2)   ;;  %v1196_v8 = vld [vmem:[%s1516_s1 + $0x28] sm:$0xff] (!%p137_p2)  }
   0x7   : > { %1062 = vmatpush3.bf16.msra.mxu0 (!%p137_p2), %v1191_v1  ;;  %1077 = vmatprep.mubr.msk.bf16.mxu0 (!%p137_p2), %vm1254_vm0, %v1253_v0  ;;  %v1197_v9 = vld [vmem:[%s1516_s1 + $0x30] sm:$0xff] (!%p137_p2)   ;;  %v1198_v10 = vld [vmem:[%s1516_s1 + $0x38] sm:$0xff] (!%p137_p2)   ;;  %v1199_v11 = vld [vmem:[%s1517_s2] sm:$0xff] (!%p137_p2)  }
   0x8   : > { %1063 = vmatprep.subr.bf16.mxu0 (!%p137_p2), %v1253_v0  ;;  %1097 = vmatprep.mubr.msk.bf16.mxu1 (!%p137_p2), %vm1254_vm0, %v1253_v0  ;;  %v1200_v12 = vld [vmem:[%s1517_s2 + $0x8] sm:$0xff] (!%p137_p2)   ;;  %v1201_v13 = vld [vmem:[%s1517_s2 + $0x10] sm:$0xff] (!%p137_p2)   ;;  %v1202_v14 = vld [vmem:[%s1517_s2 + $0x18] sm:$0xff] (!%p137_p2)  }
   0x9   : > { %1082 = vmatpush3.bf16.msra.mxu1 (!%p137_p2), %v1199_v11  ;;  %v1203_v15 = vld [vmem:[%s1517_s2 + $0x20] sm:$0xff] (!%p137_p2)   ;;  %v1204_v16 = vld [vmem:[%s1517_s2 + $0x28] sm:$0xff] (!%p137_p2)   ;;  %v1205_v23 = vld [vmem:[%s1517_s2 + $0x30] sm:$0xff] (!%p137_p2)  }
   0xa   : > { %1083 = vmatprep.subr.bf16.mxu1 (!%p137_p2), %v1253_v0  ;;  %v1206_v24 = vld [vmem:[%s1517_s2 + $0x38] sm:$0xff] (!%p137_p2)   ;;  %v1207_v32 = vld [vmem:[%s1516_s1 + $0x40] sm:$0xff] (!%p137_p2)   ;;  %v1208_v33 = vld [vmem:[%s1516_s1 + $0x48] sm:$0xff] (!%p137_p2)  }
   0xb   : > { %1064 = vmatpush3.bf16.msra.mxu0 (!%p137_p2), %v1192_v2  ;;  %v1209_v34 = vld [vmem:[%s1516_s1 + $0x50] sm:$0xff] (!%p137_p2)   ;;  %v1210_v41 = vld [vmem:[%s1516_s1 + $0x58] sm:$0xff] (!%p137_p2)   ;;  %v1211_v42 = vld [vmem:[%s1516_s1 + $0x60] sm:$0xff] (!%p137_p2)  }
   0xc   : > { %1065 = vmatprep.subr.bf16.mxu0 (!%p137_p2), %v1253_v0  ;;  %v1212_v43 = vld [vmem:[%s1516_s1 + $0x68] sm:$0xff] (!%p137_p2)   ;;  %v1213_v44 = vld [vmem:[%s1516_s1 + $0x70] sm:$0xff] (!%p137_p2)   ;;  %v1214_v45 = vld [vmem:[%s1516_s1 + $0x78] sm:$0xff] (!%p137_p2)  }
   0xd   : > { %s1520_s13 = smov (!%p158_p3, %s886_s13), 1  ;;  %1084 = vmatpush3.bf16.msra.mxu1 %v1200_v12  ;;  %v1215_v46 = vld [vmem:[%s1517_s2 + $0x40] sm:$0xff]   ;;  %v1216_v47 = vld [vmem:[%s1517_s2 + $0x48] sm:$0xff]   ;;  %v1217_v48 = vld [vmem:[%s1517_s2 + $0x50] sm:$0xff]  }
   0xe   : > { %s891_s18 = sshll.u32 %s1520_s13, 3  ;;  %1085 = vmatprep.subr.bf16.mxu1 %v1253_v0  ;;  %v1218_v49 = vld [vmem:[%s1517_s2 + $0x58] sm:$0xff]   ;;  %v1219_v50 = vld [vmem:[%s1517_s2 + $0x60] sm:$0xff]   ;;  %v1220_v51 = vld [vmem:[%s1517_s2 + $0x68] sm:$0xff]  }
   0xf   : > { %s161_s21 = scalar_lea.vmem %s1515_s0, %s891_s18  ;;  %1066 = vmatpush3.bf16.msra.mxu0 %v1193_v3  ;;  %v1221_v58 = vld [vmem:[%s1517_s2 + $0x70] sm:$0xff]   ;;  %v1222_v59 = vld [vmem:[%s1517_s2 + $0x78] sm:$0xff]   ;;  %s165_s20 = scalar_lea.vmem %s1518_s3, %s891_s18 }
  0x10   : > { %v1303_v4 = vld [vmem:[%s161_s21] sm:$0xff]  ;;  %1067 = vmatprep.subr.bf16.mxu0 %v1253_v0 }
  0x11   : > { %v200_v5 = vmul.f32 %v1303_v4, %v1303_v4  ;;  %1086 = vmatpush3.bf16.msra.mxu1 %v1201_v13  ;;  %v1226_v13 = vld [vmem:[%s1516_s1 + $0x98] sm:$0xff]  }
  0x12   : > { %1087 = vmatprep.subr.bf16.mxu1 %v1253_v0 }
  0x13   : > { %201 = vadd.xlane.f32.xlu0 %v200_v5  ;;  %1068 = vmatpush3.bf16.msra.mxu0 %v1194_v6  ;;  %v1224_v5 = vld [vmem:[%s1516_s1 + $0x88] sm:$0xff]   ;;  %v1225_v6 = vld [vmem:[%s1516_s1 + $0x90] sm:$0xff]  }
  0x14   : > { %1069 = vmatprep.subr.bf16.mxu0 %v1253_v0 }
  0x15   : > { %1088 = vmatpush3.bf16.msra.mxu1 %v1202_v14  ;;  %v1227_v14 = vld [vmem:[%s1516_s1 + $0xa0] sm:$0xff]  }
  0x16   : > { %1089 = vmatprep.subr.bf16.mxu1 %v1253_v0 }
  0x17   : > { %1070 = vmatpush3.bf16.msra.mxu0 %v1195_v7 }
  0x18   : > { %1071 = vmatprep.subr.bf16.mxu0 %v1253_v0 }
  0x19   : > { %1090 = vmatpush3.bf16.msra.mxu1 %v1203_v15  ;;  %v1228_v15 = vld [vmem:[%s1516_s1 + $0xa8] sm:$0xff]  }
  0x1a   : > { %1091 = vmatprep.subr.bf16.mxu1 %v1253_v0 }
  0x1b   : > { %1072 = vmatpush3.bf16.msra.mxu0 %v1196_v8 }
  0x1c   : > { %1073 = vmatprep.subr.bf16.mxu0 %v1253_v0 }
  0x1d   : > { %1092 = vmatpush3.bf16.msra.mxu1 %v1204_v16  ;;  %v1229_v16 = vld [vmem:[%s1516_s1 + $0xb0] sm:$0xff]  }
  0x1e   : > { %1093 = vmatprep.subr.bf16.mxu1 %v1253_v0 }
  0x1f   : > { %1074 = vmatpush3.bf16.msra.mxu0 %v1197_v9 }
  0x20   : > { %1075 = vmatprep.subr.bf16.mxu0 %v1253_v0 }
  0x21   : > { %1094 = vmatpush3.bf16.msra.mxu1 %v1205_v23  ;;  %v1236_v23 = vld [vmem:[%s1517_s2 + $0xa8] sm:$0xff]  }
  0x22   : > { %1095 = vmatprep.subr.bf16.mxu1 %v1253_v0 }
  0x23   : > { %1076 = vmatpush3.bf16.msra.mxu0 %v1198_v10 }
  0x24   : > { %1101 = vmatprep.subr.bf16.mxu0 %v1253_v0 }
  0x25   : > { %1096 = vmatpush3.bf16.msra.mxu1 %v1206_v24 }
  0x26   : > { %1121 = vmatprep.subr.bf16.mxu1 %v1253_v0 }
  0xa0   : > { %v202_v17 = vpop.xlane.xlu0 %201 }
  0xa1   : > { %v203_v18 = vmul.f32 0.03125, %v202_v17  ;;  %v1230_v17 = vld [vmem:[%s1516_s1 + $0xb8] sm:$0xff]  }
  0xa3   : > { %v204_v19 = vadd.f32 1e-06, %v203_v18  ;;  %v1231_v18 = vld [vmem:[%s1517_s2 + $0x80] sm:$0xff]  }
  0xa5   : > { %1239 = vrsqrt.f32 %v204_v19  ;;  %v1232_v19 = vld [vmem:[%s1517_s2 + $0x88] sm:$0xff]  }
  0xaf   : > { %v1240_v20 = vpop.eup %1239 }
  0xb0   : > { %v206_v21 = vmul.f32 %v1240_v20, %v1303_v4  ;;  %v1233_v20 = vld [vmem:[%s1517_s2 + $0x90] sm:$0xff]  }
  0xb2   : > { %v207_v22 = vpack.c.bf16 %v206_v21, %v206_v21  ;;  %v1234_v21 = vld [vmem:[%s1517_s2 + $0x98] sm:$0xff]  }
  0xb4   : > { %1078 = vmatmul.mubr.bf16.vlgmr.msra.gmra.mrb[0].mxu0 %v207_v22  ;;  %v1235_v22 = vld [vmem:[%s1517_s2 + $0xa0] sm:$0xff]  }
  0xb5   : > { %1117 = vmatprep.mubr.msk.bf16.mxu0 %vm1254_vm0, %v1253_v0  ;;  %1102 = vmatpush3.bf16.msra.mxu0 %v1207_v32 }
  0xb6   : > { %1103 = vmatprep.subr.bf16.mxu0 %v1253_v0 }
  0xb9   : > { %1104 = vmatpush3.bf16.msra.mxu0 %v1208_v33 }
  0xba   : > { %1105 = vmatprep.subr.bf16.mxu0 %v1253_v0 }
  0xbd   : > { %1106 = vmatpush3.bf16.msra.mxu0 %v1209_v34 }
  0xbe   : > { %1107 = vmatprep.subr.bf16.mxu0 %v1253_v0 }
  0xc1   : > { %1108 = vmatpush3.bf16.msra.mxu0 %v1210_v41 }
  0xc2   : > { %1109 = vmatprep.subr.bf16.mxu0 %v1253_v0 }
  0xc5   : > { %1110 = vmatpush3.bf16.msra.mxu0 %v1211_v42 }
  0xc6   : > { %1111 = vmatprep.subr.bf16.mxu0 %v1253_v0 }
  0xc9   : > { %1112 = vmatpush3.bf16.msra.mxu0 %v1212_v43 }
  0xca   : > { %1113 = vmatprep.subr.bf16.mxu0 %v1253_v0 }
  0xcd   : > { %1114 = vmatpush3.bf16.msra.mxu0 %v1213_v44 }
  0xce   : > { %1115 = vmatprep.subr.bf16.mxu0 %v1253_v0 }
  0xd1   : > { %1116 = vmatpush3.bf16.msra.mxu0 %v1214_v45 }
  0xd2   : > { %1141 = vmatprep.subr.bf16.mxu0 %v1253_v0 }
 0x187   : > { %v290_v25 = vpop.f32.mrb[0].mxu0 }
 0x188   : > { %v296_v26 = vmax.f32 %v290_v25, 0.0  ;;  %v1079_v27 = vpop.f32.mrb[1].mxu0 }
 0x189   : > { %v293_v28 = vpop.f32.mrb[2].mxu0 }
 0x18a   : > { %v297_v29 = vmul.f32 %v296_v26, %v296_v26  ;;  %v1080_v30 = vpop.f32.mrb[3].mxu0 }
 0x18b   : > { %v1237_v30 = vld [vmem:[%s1517_s2 + $0xb0] sm:$0xff]  }
 0x18c   : > { %v298_v31 = vpack.c.bf16 %v297_v29, %v297_v29 }
 0x18e   : > { %1098 = vmatmul.mubr.bf16.vlgmr.msra.gmra.mrb[0].mxu1 %v298_v31  ;;  %v1238_v31 = vld [vmem:[%s1517_s2 + $0xb8] sm:$0xff]  }
 0x18f   : > { %1137 = vmatprep.mubr.msk.bf16.mxu1 %vm1254_vm0, %v1253_v0  ;;  %1122 = vmatpush3.bf16.msra.mxu1 %v1215_v46 }
 0x190   : > { %1123 = vmatprep.subr.bf16.mxu1 %v1253_v0 }
 0x193   : > { %1124 = vmatpush3.bf16.msra.mxu1 %v1216_v47 }
 0x194   : > { %1125 = vmatprep.subr.bf16.mxu1 %v1253_v0 }
 0x197   : > { %1126 = vmatpush3.bf16.msra.mxu1 %v1217_v48 }
 0x198   : > { %1127 = vmatprep.subr.bf16.mxu1 %v1253_v0 }
 0x19b   : > { %1128 = vmatpush3.bf16.msra.mxu1 %v1218_v49 }
 0x19c   : > { %1129 = vmatprep.subr.bf16.mxu1 %v1253_v0 }
 0x19f   : > { %1130 = vmatpush3.bf16.msra.mxu1 %v1219_v50 }
 0x1a0   : > { %1131 = vmatprep.subr.bf16.mxu1 %v1253_v0 }
 0x1a3   : > { %1132 = vmatpush3.bf16.msra.mxu1 %v1220_v51 }
 0x1a4   : > { %1133 = vmatprep.subr.bf16.mxu1 %v1253_v0 }
 0x1a7   : > { %1134 = vmatpush3.bf16.msra.mxu1 %v1221_v58 }
 0x1a8   : > { %1135 = vmatprep.subr.bf16.mxu1 %v1253_v0 }
 0x1ab   : > { %1136 = vmatpush3.bf16.msra.mxu1 %v1222_v59 }
 0x1ac   : > { %1161 = vmatprep.subr.bf16.mxu1 %v1253_v0 }
 0x261   : > { %v381_v35 = vpop.f32.mrb[0].mxu1 }
 0x262   : > { %v1383_v36 = vadd.f32 %v381_v35, %v1303_v4  ;;  %v1099_v37 = vpop.f32.mrb[1].mxu1  ;;  %v1223_v4 = vld [vmem:[%s1516_s1 + $0x80] sm:$0xff]  }
 0x263   : > { %v384_v38 = vpop.f32.mrb[2].mxu1 }
 0x264   : > { %v1100_v39 = vpop.f32.mrb[3].mxu1  ;;  %v422_v40 = vmul.f32 %v1383_v36, %v1383_v36 }
 0x266   : > { %423 = vadd.xlane.f32.xlu0 %v422_v40 }
 0x2f3   : > { %v424_v52 = vpop.xlane.xlu0 %423 }
 0x2f4   : > { %v425_v53 = vmul.f32 0.03125, %v424_v52 }
 0x2f6   : > { %v426_v54 = vadd.f32 1e-06, %v425_v53 }
 0x2f8   : > { %1241 = vrsqrt.f32 %v426_v54 }
 0x302   : > { %v1242_v55 = vpop.eup %1241 }
 0x303   : > { %v428_v56 = vmul.f32 %v1242_v55, %v1383_v36 }
 0x305   : > { %v429_v57 = vpack.c.bf16 %v428_v56, %v428_v56 }
 0x307   : > { %1118 = vmatmul.mubr.bf16.vlgmr.msra.gmra.mrb[4].mxu0 %v429_v57 }
 0x308   : > { %1157 = vmatprep.mubr.msk.bf16.mxu0 %vm1254_vm0, %v1253_v0  ;;  %1142 = vmatpush3.bf16.msra.mxu0 %v1223_v4 }
 0x309   : > { %1143 = vmatprep.subr.bf16.mxu0 %v1253_v0 }
 0x30c   : > { %1144 = vmatpush3.bf16.msra.mxu0 %v1224_v5 }
 0x30d   : > { %1145 = vmatprep.subr.bf16.mxu0 %v1253_v0 }
 0x310   : > { %1146 = vmatpush3.bf16.msra.mxu0 %v1225_v6 }
 0x311   : > { %1147 = vmatprep.subr.bf16.mxu0 %v1253_v0 }
 0x314   : > { %1148 = vmatpush3.bf16.msra.mxu0 %v1226_v13 }
 0x315   : > { %1149 = vmatprep.subr.bf16.mxu0 %v1253_v0 }
 0x318   : > { %1150 = vmatpush3.bf16.msra.mxu0 %v1227_v14 }
 0x319   : > { %1151 = vmatprep.subr.bf16.mxu0 %v1253_v0 }
 0x31c   : > { %1152 = vmatpush3.bf16.msra.mxu0 %v1228_v15 }
 0x31d   : > { %1153 = vmatprep.subr.bf16.mxu0 %v1253_v0 }
 0x320   : > { %1154 = vmatpush3.bf16.msra.mxu0 %v1229_v16 }
 0x321   : > { %1155 = vmatprep.subr.bf16.mxu0 %v1253_v0 }
 0x324   : > { %1156 = vmatpush3.bf16.msra.mxu0 %v1230_v17 }
 0x3da   : > { %v512_v60 = vpop.f32.mrb[4].mxu0 }
 0x3db   : > { %v518_v61 = vmax.f32 %v512_v60, 0.0  ;;  %v1119_v62 = vpop.f32.mrb[5].mxu0 }
 0x3dc   : > { %v515_v63 = vpop.f32.mrb[6].mxu0 }
 0x3dd   : > { %v519_v1 = vmul.f32 %v518_v61, %v518_v61  ;;  %v1120_v2 = vpop.f32.mrb[7].mxu0 }
 0x3df   : > { %v520_v3 = vpack.c.bf16 %v519_v1, %v519_v1 }
 0x3e1   : > { %1138 = vmatmul.mubr.bf16.vlgmr.msra.gmra.mrb[4].mxu1 %v520_v3 }
 0x3e2   : > { %1177 = vmatprep.mubr.msk.bf16.mxu1 %vm1254_vm0, %v1253_v0  ;;  %1162 = vmatpush3.bf16.msra.mxu1 %v1231_v18 }
 0x3e3   : > { %1163 = vmatprep.subr.bf16.mxu1 %v1253_v0 }
 0x3e6   : > { %1164 = vmatpush3.bf16.msra.mxu1 %v1232_v19 }
 0x3e7   : > { %1165 = vmatprep.subr.bf16.mxu1 %v1253_v0 }
 0x3ea   : > { %1166 = vmatpush3.bf16.msra.mxu1 %v1233_v20 }
 0x3eb   : > { %1167 = vmatprep.subr.bf16.mxu1 %v1253_v0 }
 0x3ee   : > { %1168 = vmatpush3.bf16.msra.mxu1 %v1234_v21 }
 0x3ef   : > { %1169 = vmatprep.subr.bf16.mxu1 %v1253_v0 }
 0x3f2   : > { %1170 = vmatpush3.bf16.msra.mxu1 %v1235_v22 }
 0x3f3   : > { %1171 = vmatprep.subr.bf16.mxu1 %v1253_v0 }
 0x3f6   : > { %1172 = vmatpush3.bf16.msra.mxu1 %v1236_v23 }
 0x3f7   : > { %1173 = vmatprep.subr.bf16.mxu1 %v1253_v0 }
 0x3fa   : > { %1174 = vmatpush3.bf16.msra.mxu1 %v1237_v30 }
 0x3fb   : > { %1175 = vmatprep.subr.bf16.mxu1 %v1253_v0 }
 0x3fe   : > { %1176 = vmatpush3.bf16.msra.mxu1 %v1238_v31 }
 0x4b4   : > { %v603_v7 = vpop.f32.mrb[4].mxu1 }
 0x4b5   : > { %v609_v8 = vadd.f32 %v603_v7, %v1383_v36  ;;  %v1139_v9 = vpop.f32.mrb[5].mxu1 }
 0x4b6   : > { %v606_v10 = vpop.f32.mrb[6].mxu1 }
 0x4b7   : > { %v1140_v11 = vpop.f32.mrb[7].mxu1  ;;  %v644_v12 = vmul.f32 %v609_v8, %v609_v8 }
 0x4b9   : > { %645 = vadd.xlane.f32.xlu1 %v644_v12 }
 0x546   : > { %v646_v24 = vpop.xlane.xlu1 %645 }
 0x547   : > { %v647_v25 = vmul.f32 0.03125, %v646_v24 }
 0x549   : > { %v648_v26 = vadd.f32 1e-06, %v647_v25 }
 0x54b   : > { %1243 = vrsqrt.f32 %v648_v26 }
 0x555   : > { %v1244_v27 = vpop.eup %1243 }
 0x556   : > { %v650_v28 = vmul.f32 %v1244_v27, %v609_v8 }
 0x558   : > { %v651_v29 = vpack.c.bf16 %v650_v28, %v650_v28 }
 0x55a   : > { %1158 = vmatmul.mubr.bf16.vlgmr.msra.gmra.mrb[8].mxu0 %v651_v29 }
 0x62d   : > { %v734_v32 = vpop.f32.mrb[8].mxu0 }
 0x62e   : > { %v740_v33 = vmax.f32 %v734_v32, 0.0  ;;  %v1159_v34 = vpop.f32.mrb[9].mxu0 }
 0x62f   : > { %v737_v35 = vpop.f32.mrb[10].mxu0 }
 0x630   : > { %v741_v36 = vmul.f32 %v740_v33, %v740_v33  ;;  %v1160_v37 = vpop.f32.mrb[11].mxu0 }
 0x632   : > { %v742_v38 = vpack.c.bf16 %v741_v36, %v741_v36 }
 0x634   : > { %1178 = vmatmul.mubr.bf16.vlgmr.msra.gmra.mrb[8].mxu1 %v742_v38 }
 0x707   : > { %v825_v39 = vpop.f32.mrb[8].mxu1 }
 0x708   : > { %v831_v0 = vadd.f32 %v825_v39, %v609_v8  ;;  %v1179_v40 = vpop.f32.mrb[9].mxu1 }
 0x709   : > { %v828_v41 = vpop.f32.mrb[10].mxu1 }
 0x70a   : > { %832 = vst [vmem:[%s165_s20] sm:$0xff] %v831_v0  ;;  %v1180_v42 = vpop.f32.mrb[11].mxu1 }
 0x70b PF: > { %s13_s12 = sadd.s32 1, %s1251_s12  }
 0x70c   : > { %p10_p4 = scmp.ge.s32.totalorder %s13_s12, 4  }
 0x70e   :  { %12 = sbr.rel (!%p10_p4) target bundleno = 1 (0x1), region = 66 }

</bundles_post_ra>
